<compile_context>
chip_gen: v7x
topology: tpu7x:2x2x1
jax: 0.10.0
libtpu: 0.0.40
codegen_flags: <defaults>
</compile_context>

<pallas_src>
import functools

import jax
import jax.numpy as jnp
from jax.experimental import pallas as pl
from jax.experimental.pallas import tpu as pltpu


# ----------------------------------------------------------------------------
# Faithful translation of Base.forward: a no-op.
# ----------------------------------------------------------------------------
class BasePallas:
    """JAX/Pallas counterpart of the PyTorch `Base` module."""

    def __init__(self):
        # No parameters in the reference __init__.
        self._state = {}

    def forward(self):
        # Reference forward body is `pass` -> returns None.
        # TODO(synk): no tensor ops exist in Base.forward; nothing to lower.
        return None

    __call__ = forward

    @property
    def out_features(self):
        """Output feature dimension (None unless a subclass sets it)."""
        if self._state.get("_out_features") is None:
            return None
        return self._state["_out_features"]


# ----------------------------------------------------------------------------
# Demo Pallas kernel (identity copy) — proves the pallas_call plumbing works.
# Not part of Base's semantics (Base has no compute).
# ----------------------------------------------------------------------------
def _identity_kernel(x_ref, o_ref):
    o_ref[...] = x_ref[...]


def _choose_tiles(rows: int, cols: int, itemsize: int):
    """Dtype-aware, lane-dense tile selection for a memory-bound 2-D copy."""
    # Minimum sublane multiple: 8 for 4-byte, 16 for 2-byte, 32 for 1-byte.
    sublane = {4: 8, 2: 16, 1: 32}.get(itemsize, 8)

    # Lane (last-dim) tile: full extent when modest, otherwise a large
    # multiple of 128 so stores stay unmasked and per-block VMEM is bounded.
    if cols % 128 == 0 and cols > 4096:
        tile_c = 4096
        while cols % tile_c:
            tile_c -= 128
    else:
        tile_c = cols

    # Row tile: target ~2 MiB per block.  Double-buffered input + output is
    # ~4x that live in VMEM (~8 MiB), comfortably inside v7x's 64 MiB.
    target_bytes = 2 * 1024 * 1024
    tile_r = (target_bytes // max(1, tile_c * itemsize)) // sublane * sublane
    tile_r = max(sublane, tile_r)

    if tile_r >= rows:
        tile_r = rows  # full extent is always a legal block dim
        # Prefer >=2 grid steps along rows so v7x's two TensorCores both get
        # work (near-neutral on v5e/v6e which have a single TC).
        if rows > sublane and rows % (2 * sublane) == 0:
            tile_r = rows // 2
    return tile_r, tile_c


@functools.partial(jax.jit, donate_argnums=0)
def identity_pallas(x: jax.Array) -> jax.Array:
    rows, cols = x.shape
    itemsize = jnp.dtype(x.dtype).itemsize
    tile_r, tile_c = _choose_tiles(rows, cols, itemsize)
    grid = (pl.cdiv(rows, tile_r), pl.cdiv(cols, tile_c))

    return pl.pallas_call(
        _identity_kernel,
        out_shape=jax.ShapeDtypeStruct((rows, cols), x.dtype),
        grid=grid,
        in_specs=[pl.BlockSpec((tile_r, tile_c), lambda i, j: (i, j))],
        out_specs=pl.BlockSpec((tile_r, tile_c), lambda i, j: (i, j)),
        # Identity: alias input buffer to output to kill the HBM round trip.
        input_output_aliases={0: 0},
        compiler_params=pltpu.CompilerParams(
            dimension_semantics=("parallel", "parallel"),
        ),
    )(x)


if __name__ == "__main__":
    # 1) Exercise the faithful Base translation.
    model = BasePallas()
    out = model()            # forward() -> None, exactly like the reference
    assert out is None
    assert model.out_features is None

    # 2) Run the demo identity kernel on deterministic inputs.
    key = jax.random.PRNGKey(0)
    k1, k2 = jax.random.split(key)

    # f32 case (sublane multiple 8): 256 x 512 -> tiles (128, 512), grid (2, 1)
    x = jax.random.normal(k1, (256, 512), dtype=jnp.float32)
    x_check = x + 0.0               # independent copy (input is donated/aliased)
    y = identity_pallas(x)
    jax.block_until_ready(y)
    assert jnp.allclose(y, x_check), "identity kernel mismatch (f32)"

    # bf16 case (sublane multiple 16): 64 x 256 -> tiles (32, 256), grid (2, 1)
    xb = jax.random.normal(k2, (64, 256), dtype=jnp.float32).astype(jnp.bfloat16)
    xb_check = xb + jnp.zeros_like(xb)
    yb = identity_pallas(xb)
    jax.block_until_ready(yb)
    assert jnp.array_equal(yb, xb_check), "identity kernel mismatch (bf16)"

    print("KERNEL_OK")
</pallas_src>

<mosaic_0001>
module attributes {stable_mosaic.version = 11 : i64} {
  func.func @_identity_kernel(%arg0: i32, %arg1: i32, %arg2: memref<128x512xf32, #tpu.memory_space<vmem>>, %arg3: memref<128x512xf32, #tpu.memory_space<vmem>>) attributes {dimension_semantics = [#tpu.dimension_semantics<parallel>, #tpu.dimension_semantics<parallel>], iteration_bounds = array<i64: 2, 1>, scalar_prefetch = 0 : i64, scratch_operands = 0 : i64, tpu.core_type = #tpu.core_type<tc>, window_params = [{transform_indices = @transform_0, window_bounds = array<i64: 128, 512>}, {transform_indices = @transform_1, window_bounds = array<i64: 128, 512>}]} {
    %c0 = arith.constant 0 : index
    %c0_0 = arith.constant 0 : index
    %0 = vector.load %arg2[%c0, %c0_0] : memref<128x512xf32, #tpu.memory_space<vmem>>, vector<128x512xf32>
    %c0_1 = arith.constant 0 : index
    %c0_2 = arith.constant 0 : index
    %1 = vector.load %arg3[%c0_1, %c0_2] : memref<128x512xf32, #tpu.memory_space<vmem>>, vector<128x512xf32>
    tpu.vector_store %arg3[%c0_1, %c0_2], %0 {strides = array<i32>} : memref<128x512xf32, #tpu.memory_space<vmem>>, vector<128x512xf32>,
    return
  }
  func.func @transform_0(%arg0: i32, %arg1: i32) -> (i32, i32) {
    %c0_i32 = arith.constant 0 : i32
    return %arg0, %arg1 : i32, i32
  }
  func.func @transform_1(%arg0: i32, %arg1: i32) -> (i32, i32) {
    %c0_i32 = arith.constant 0 : i32
    return %arg0, %arg1 : i32, i32
  }
}

</mosaic_0001>

<bundles_post_ra>
// kernel: identity_pallas.1
= control target key start
LH: loop header
LB: loop body
LE: loop exit
PB: predicated region body
PF: predicated region fallthrough
CT: control target
= control target key end

     0   :  { %6 = vsyncpa [#allocation3], 0  ;;  %s915_s0 = inlined_call_operand.hbm [shape: f32[256,512], index: 0, kind: input, shape index: {}, may-alias: {0,1}]   ;;  %s916_s1 = inlined_call_operand.hbm [shape: f32[256,512], index: 1, kind: output, shape index: {}, may-alias: {0,1}]  }
   0x1   :  { %8 = vsyncpa [#allocation3 + $0x1], 0 }
   0x2   :  { %9 = vsyncpa [#allocation4], 0 }
   0x3   :  { %11 = vsyncpa [#allocation4 + $0x1], 0  ;;  %s607_s6 = smov 0   ;;  %s609_s7 = smov 0  }
   0x4   :  { %s611_s8 = smov 0   ;;  %s613_s9 = smov 0  }
   0x5   :  { %s615_s10 = smov 0   ;;  %s617_s11 = smov 0  }
   0x6 LB: > { %s390_s12 = sadd.s32 4294967295, %s589_s11   ;;  %s391_s13 = sadd.s32 4294967294, %s589_s11   ;;  %s589_s11 = sphi %s617_s11, %s17_s11   ;;  %s585_s10 = sphi %s615_s10, %s931_s10   ;;  %s581_s9 = sphi %s613_s9, %s930_s9   ;;  %s577_s8 = sphi %s611_s8, %s929_s8   ;;  %s573_s7 = sphi %s609_s7, %s928_s7   ;;  %s569_s6 = sphi %s607_s6, %s927_s6  }
   0x7   : > { %s29_s14 = sadd.s32 1, %s585_s10  ;;  %s38_s15 = sadd.s32 1, %s577_s8 }
   0x8   : > { %p31_p0 = scmp.ge.s32.totalorder %s29_s14, 2  ;;  %p45_p1 = scmp.ne.s32.totalorder %s577_s8, %s573_s7 }
   0x9   : > { %p46_p2 = scmp.eq.s32.totalorder %s589_s11, 0  ;;  %p51_p3 = scmp.ne.s32.totalorder %s573_s7, %s569_s6 }
   0xa   : > { %s933_s14 = smov (%p31_p0, %s29_s14), 0  ;;  %p52_p5 = scmp.eq.s32.totalorder %s390_s12, 0 }
   0xb   : > { %p648_p4 = por %p46_p2, %p45_p1  ;;  %s33_s17 = ssub.s32 %s585_s10, %s933_s14 }
   0xc   : > { %p77_p6 = scmp.eq.s32.totalorder %s390_s12, 1  ;;  %p36_p7 = scmp.eq.s32.totalorder %s33_s17, 0 }
   0xd   : > { %p654_p8 = por %p52_p5, %p51_p3  ;;  %p83_p10 = scmp.eq.s32.totalorder %s391_s13, 1 }
   0xe   : > { %p658_p9 = por %p77_p6, %p45_p1  ;;  %p423_p13 = scmp.lt.s32.totalorder %s589_s11, 2 }
   0xf   : > { %s663_s20 = scalar_select %p36_p7, %s577_s8, %s38_s15  }
  0x10   : > { %s920_s19 = scalar_select %p658_p9, 1, 0 }
  0x11   : > { %p665_p11 = por %p83_p10, %p51_p3  ;;  %s103_s22 = sand.u32 1, %s577_s8  }
  0x12   : > { %s394_s23 = sshll.u32 %s103_s22, 9  ;;  %s408_s24 = sshll.u32 %s585_s10, 13 }
  0x13   : > { %s921_s21 = scalar_select %p665_p11, 1, 0 }
  0x14   : > { %s676_s27 = scalar_lea.hbm %s915_s0, %s408_s24  ;;  %s107_s28 = scalar_lea.vmem [#allocation2], %s394_s23 }
  0x15   : > { %s117_s29 = sshll.u32 %s107_s28, 4  ;;  %p682_p0 = pnand %p423_p13, %p648_p4  ;;  %s678_s29 = int_to_ptr.vmem [resolvable:$true] %s117_s29 }
  0x16   : > { %s687_s2 = scalar_lea.sflag [#allocation3], %s103_s22  ;;  %s477_s3 = scalar_lea.hbm %s676_s27, 8192 }
  0x17   : > { %p478_p2 = scmp.ne.s32.totalorder %s676_s27, %s477_s3  ;;  %p479_p3 = pneg %p682_p0 }
  0x18   : > { %s482_s12 = scalar_lea.hbm %s915_s0, 16384  ;;  %p483_p4 = scmp.lt.u32.totalorder %s676_s27, %s915_s0 }
  0x19   : > { %p480_p5 = pnand %p479_p3, %p478_p2  ;;  %p484_p7 = scmp.lt.u32.totalorder %s482_s12, %s477_s3 }
  0x1a   : > { %p486_p13 = scmp.lt.u32.totalorder %s477_s3, %s676_s27 }
  0x1b   : > { %p481_p6 = pneg %p480_p5  ;;  %p485_p10 = por %p484_p7, %p483_p4 }
  0x1d   : > { %p487_p12 = por %p486_p13, %p485_p10 }
  0x1f   : > { %p488_p1 = pnand %p487_p12, %p481_p6 }
  0x21   : > { %491 = shalt.err (!%p488_p1)
}
  0x22   : > { %s492_s16 = scalar_lea.vmem %s678_s29, 8192  ;;  %s591_s17 = smov [#allocation2]  }
  0x23   : > { %p493_p2 = scmp.ne.s32.totalorder %s678_s29, %s492_s16  ;;  %s497_s22 = sshll.u32 %s591_s17, 4  ;;  %s498_s22 = int_to_ptr.vmem [resolvable:$false] %s497_s22 }
  0x24   : > { %s499_s23 = scalar_lea.vmem %s498_s22, 16384  ;;  %p500_p9 = scmp.lt.s32.totalorder %s678_s29, %s498_s22 }
  0x25   : > { %p495_p5 = pnand %p493_p2, %p479_p3  ;;  %p501_p4 = scmp.lt.s32.totalorder %s499_s23, %s492_s16 }
  0x27   : > { %p496_p11 = pneg %p495_p5  ;;  %p502_p7 = por %p501_p4, %p500_p9 }
  0x29   : > { %p503_p10 = pnand %p502_p7, %p496_p11 }
  0x2b   : > { %506 = shalt.err (!%p503_p10)
}
  0x2c   : > { %s592_s24 = smov 512   ;;  %s593_s25 = smov 32  }
  0x2d   : > { %418 = dma.hbm_to_vmem [thread:$0]  (!%p682_p0), %s676_s27, 8192, %s678_s29, %s687_s2, %s592_s24, %s592_s24, %s593_s25  }
  0x2e   : > { %p125_p12 = scmp.lt.s32.totalorder %s589_s11, 3  ;;  %p923_p1 = scmp.ge.s32.totalorder %s589_s11, 1 }
  0x30   : > { %p126_p3 = pnand %p923_p1, %p125_p12 }
  0x31   : > { %s719_s26 = sand.u32 (!%p126_p3), 1, %s573_s7  }
  0x32   : > { %129 = sbr.rel (%p126_p3) target bundleno = 105 (0x69), region = 24  ;;  %s399_s28 = sshll.u32 (!%p126_p3), %s719_s26, 9 }
  0x33   : > { %s132_s3 = scalar_lea.sflag (!%p126_p3), [#allocation3], %s719_s26  ;;  %s723_s4 = scalar_lea.vmem (!%p126_p3), [#allocation2], %s399_s28 }
  0x39   : > { %560 = dma.done.wait (%p654_p8), %s132_s3, 8192  }
  0x3a   : > { %562 = vsyncadd (%p654_p8), %s132_s3, 4294959104  ;;  %v158_v0 = vld [vmem:[%s723_s4] sm:$0xff]  ;;  %v159_v1 = vld [vmem:[%s723_s4 + $0x8] sm:$0xff]  ;;  %s732_s27 = scalar_lea.vmem [#allocation5], %s399_s28  ;;  %s410_s18 = sshll.u32 %s581_s9, 13 }
  0x3b   : > { %v160_v2 = vld [vmem:[%s723_s4 + $0x10] sm:$0xff]  ;;  %222 = vst [vmem:[%s732_s27] sm:$0xff] %v158_v0  ;;  %223 = vst [vmem:[%s732_s27 + $0x8] sm:$0xff] %v159_v1  ;;  %v161_v3 = vld [vmem:[%s723_s4 + $0x18] sm:$0xff]  ;;  %s303_s29 = sshll.u32 %s732_s27, 4  ;;  %s853_s2 = scalar_lea.hbm %s916_s1, %s410_s18  ;;  %s855_s29 = int_to_ptr.vmem [resolvable:$true] %s303_s29 }
  0x3c   : > { %224 = vst [vmem:[%s732_s27 + $0x10] sm:$0xff] %v160_v2  ;;  %v162_v4 = vld [vmem:[%s723_s4 + $0x20] sm:$0xff]  ;;  %v163_v5 = vld [vmem:[%s723_s4 + $0x28] sm:$0xff]  ;;  %225 = vst [vmem:[%s732_s27 + $0x18] sm:$0xff] %v161_v3  ;;  %s287_s5 = scalar_lea.sflag [#allocation4], %s719_s26  ;;  %s507_s12 = scalar_lea.vmem %s855_s29, 8192 }
  0x3d   : > { %226 = vst [vmem:[%s732_s27 + $0x20] sm:$0xff] %v162_v4  ;;  %227 = vst [vmem:[%s732_s27 + $0x28] sm:$0xff] %v163_v5  ;;  %v164_v6 = vld [vmem:[%s723_s4 + $0x30] sm:$0xff]  ;;  %v165_v7 = vld [vmem:[%s723_s4 + $0x38] sm:$0xff]  ;;  %p508_p8 = scmp.ne.s32.totalorder %s855_s29, %s507_s12  ;;  %p924_p9 = scmp.ne.s32.totalorder %s920_s19, 0 }
  0x3e   : > { %v166_v8 = vld [vmem:[%s723_s4 + $0x40] sm:$0xff]  ;;  %228 = vst [vmem:[%s732_s27 + $0x30] sm:$0xff] %v164_v6  ;;  %229 = vst [vmem:[%s732_s27 + $0x38] sm:$0xff] %v165_v7  ;;  %v167_v9 = vld [vmem:[%s723_s4 + $0x48] sm:$0xff]  ;;  %s594_s13 = smov [#allocation5]  }
  0x3f   : > { %230 = vst [vmem:[%s732_s27 + $0x40] sm:$0xff] %v166_v8  ;;  %v168_v10 = vld [vmem:[%s723_s4 + $0x50] sm:$0xff]  ;;  %v169_v11 = vld [vmem:[%s723_s4 + $0x58] sm:$0xff]  ;;  %231 = vst [vmem:[%s732_s27 + $0x48] sm:$0xff] %v167_v9  ;;  %p509_p11 = pnand %p508_p8, %p924_p9  ;;  %s511_s15 = sshll.u32 %s594_s13, 4  ;;  %s512_s15 = int_to_ptr.vmem [resolvable:$false] %s511_s15 }
  0x40   : > { %232 = vst [vmem:[%s732_s27 + $0x50] sm:$0xff] %v168_v10  ;;  %233 = vst [vmem:[%s732_s27 + $0x58] sm:$0xff] %v169_v11  ;;  %v170_v12 = vld [vmem:[%s723_s4 + $0x60] sm:$0xff]  ;;  %v171_v13 = vld [vmem:[%s723_s4 + $0x68] sm:$0xff]  ;;  %s513_s16 = scalar_lea.vmem %s512_s15, 16384  ;;  %p514_p6 = scmp.lt.s32.totalorder %s855_s29, %s512_s15 }
  0x41   : > { %v172_v14 = vld [vmem:[%s723_s4 + $0x70] sm:$0xff]  ;;  %234 = vst [vmem:[%s732_s27 + $0x60] sm:$0xff] %v170_v12  ;;  %235 = vst [vmem:[%s732_s27 + $0x68] sm:$0xff] %v171_v13  ;;  %v173_v15 = vld [vmem:[%s723_s4 + $0x78] sm:$0xff]  ;;  %p510_p0 = pneg %p509_p11  ;;  %p515_p13 = scmp.lt.s32.totalorder %s513_s16, %s507_s12 }
  0x42   : > { %236 = vst [vmem:[%s732_s27 + $0x70] sm:$0xff] %v172_v14  ;;  %v174_v16 = vld [vmem:[%s723_s4 + $0x80] sm:$0xff]  ;;  %v175_v17 = vld [vmem:[%s723_s4 + $0x88] sm:$0xff]  ;;  %237 = vst [vmem:[%s732_s27 + $0x78] sm:$0xff] %v173_v15 }
  0x43   : > { %238 = vst [vmem:[%s732_s27 + $0x80] sm:$0xff] %v174_v16  ;;  %239 = vst [vmem:[%s732_s27 + $0x88] sm:$0xff] %v175_v17  ;;  %v176_v18 = vld [vmem:[%s723_s4 + $0x90] sm:$0xff]  ;;  %v177_v19 = vld [vmem:[%s723_s4 + $0x98] sm:$0xff]  ;;  %p516_p2 = por %p515_p13, %p514_p6 }
  0x44   : > { %v178_v20 = vld [vmem:[%s723_s4 + $0xa0] sm:$0xff]  ;;  %240 = vst [vmem:[%s732_s27 + $0x90] sm:$0xff] %v176_v18  ;;  %241 = vst [vmem:[%s732_s27 + $0x98] sm:$0xff] %v177_v19  ;;  %v179_v21 = vld [vmem:[%s723_s4 + $0xa8] sm:$0xff] }
  0x45   : > { %242 = vst [vmem:[%s732_s27 + $0xa0] sm:$0xff] %v178_v20  ;;  %v180_v22 = vld [vmem:[%s723_s4 + $0xb0] sm:$0xff]  ;;  %v181_v23 = vld [vmem:[%s723_s4 + $0xb8] sm:$0xff]  ;;  %243 = vst [vmem:[%s732_s27 + $0xa8] sm:$0xff] %v179_v21  ;;  %p517_p5 = pnand %p516_p2, %p510_p0 }
  0x46   : > { %244 = vst [vmem:[%s732_s27 + $0xb0] sm:$0xff] %v180_v22  ;;  %245 = vst [vmem:[%s732_s27 + $0xb8] sm:$0xff] %v181_v23  ;;  %v182_v24 = vld [vmem:[%s723_s4 + $0xc0] sm:$0xff]  ;;  %v183_v25 = vld [vmem:[%s723_s4 + $0xc8] sm:$0xff] }
  0x47   : > { %v184_v26 = vld [vmem:[%s723_s4 + $0xd0] sm:$0xff]  ;;  %246 = vst [vmem:[%s732_s27 + $0xc0] sm:$0xff] %v182_v24  ;;  %247 = vst [vmem:[%s732_s27 + $0xc8] sm:$0xff] %v183_v25  ;;  %v185_v27 = vld [vmem:[%s723_s4 + $0xd8] sm:$0xff] }
  0x48   : > { %248 = vst [vmem:[%s732_s27 + $0xd0] sm:$0xff] %v184_v26  ;;  %v186_v28 = vld [vmem:[%s723_s4 + $0xe0] sm:$0xff]  ;;  %v187_v29 = vld [vmem:[%s723_s4 + $0xe8] sm:$0xff]  ;;  %249 = vst [vmem:[%s732_s27 + $0xd8] sm:$0xff] %v185_v27 }
  0x49   : > { %250 = vst [vmem:[%s732_s27 + $0xe0] sm:$0xff] %v186_v28  ;;  %251 = vst [vmem:[%s732_s27 + $0xe8] sm:$0xff] %v187_v29  ;;  %v188_v30 = vld [vmem:[%s723_s4 + $0xf0] sm:$0xff]  ;;  %v189_v31 = vld [vmem:[%s723_s4 + $0xf8] sm:$0xff] }
  0x4a   : > { %v190_v32 = vld [vmem:[%s723_s4 + $0x100] sm:$0xff]  ;;  %252 = vst [vmem:[%s732_s27 + $0xf0] sm:$0xff] %v188_v30  ;;  %253 = vst [vmem:[%s732_s27 + $0xf8] sm:$0xff] %v189_v31  ;;  %v191_v33 = vld [vmem:[%s723_s4 + $0x108] sm:$0xff] }
  0x4b   : > { %254 = vst [vmem:[%s732_s27 + $0x100] sm:$0xff] %v190_v32  ;;  %v192_v34 = vld [vmem:[%s723_s4 + $0x110] sm:$0xff]  ;;  %v193_v35 = vld [vmem:[%s723_s4 + $0x118] sm:$0xff]  ;;  %255 = vst [vmem:[%s732_s27 + $0x108] sm:$0xff] %v191_v33 }
  0x4c   : > { %256 = vst [vmem:[%s732_s27 + $0x110] sm:$0xff] %v192_v34  ;;  %257 = vst [vmem:[%s732_s27 + $0x118] sm:$0xff] %v193_v35  ;;  %v194_v36 = vld [vmem:[%s723_s4 + $0x120] sm:$0xff]  ;;  %v195_v37 = vld [vmem:[%s723_s4 + $0x128] sm:$0xff] }
  0x4d   : > { %v196_v38 = vld [vmem:[%s723_s4 + $0x130] sm:$0xff]  ;;  %258 = vst [vmem:[%s732_s27 + $0x120] sm:$0xff] %v194_v36  ;;  %259 = vst [vmem:[%s732_s27 + $0x128] sm:$0xff] %v195_v37  ;;  %v197_v39 = vld [vmem:[%s723_s4 + $0x138] sm:$0xff] }
  0x4e   : > { %260 = vst [vmem:[%s732_s27 + $0x130] sm:$0xff] %v196_v38  ;;  %v198_v40 = vld [vmem:[%s723_s4 + $0x140] sm:$0xff]  ;;  %v199_v41 = vld [vmem:[%s723_s4 + $0x148] sm:$0xff]  ;;  %261 = vst [vmem:[%s732_s27 + $0x138] sm:$0xff] %v197_v39 }
  0x4f   : > { %262 = vst [vmem:[%s732_s27 + $0x140] sm:$0xff] %v198_v40  ;;  %263 = vst [vmem:[%s732_s27 + $0x148] sm:$0xff] %v199_v41  ;;  %v200_v42 = vld [vmem:[%s723_s4 + $0x150] sm:$0xff]  ;;  %v201_v43 = vld [vmem:[%s723_s4 + $0x158] sm:$0xff] }
  0x50   : > { %v202_v44 = vld [vmem:[%s723_s4 + $0x160] sm:$0xff]  ;;  %264 = vst [vmem:[%s732_s27 + $0x150] sm:$0xff] %v200_v42  ;;  %265 = vst [vmem:[%s732_s27 + $0x158] sm:$0xff] %v201_v43  ;;  %v203_v45 = vld [vmem:[%s723_s4 + $0x168] sm:$0xff] }
  0x51   : > { %266 = vst [vmem:[%s732_s27 + $0x160] sm:$0xff] %v202_v44  ;;  %v204_v46 = vld [vmem:[%s723_s4 + $0x170] sm:$0xff]  ;;  %v205_v47 = vld [vmem:[%s723_s4 + $0x178] sm:$0xff]  ;;  %267 = vst [vmem:[%s732_s27 + $0x168] sm:$0xff] %v203_v45 }
  0x52   : > { %268 = vst [vmem:[%s732_s27 + $0x170] sm:$0xff] %v204_v46  ;;  %269 = vst [vmem:[%s732_s27 + $0x178] sm:$0xff] %v205_v47  ;;  %v206_v48 = vld [vmem:[%s723_s4 + $0x180] sm:$0xff]  ;;  %v207_v49 = vld [vmem:[%s723_s4 + $0x188] sm:$0xff] }
  0x53   : > { %v208_v50 = vld [vmem:[%s723_s4 + $0x190] sm:$0xff]  ;;  %270 = vst [vmem:[%s732_s27 + $0x180] sm:$0xff] %v206_v48  ;;  %271 = vst [vmem:[%s732_s27 + $0x188] sm:$0xff] %v207_v49  ;;  %v209_v51 = vld [vmem:[%s723_s4 + $0x198] sm:$0xff] }
  0x54   : > { %272 = vst [vmem:[%s732_s27 + $0x190] sm:$0xff] %v208_v50  ;;  %v210_v52 = vld [vmem:[%s723_s4 + $0x1a0] sm:$0xff]  ;;  %v211_v53 = vld [vmem:[%s723_s4 + $0x1a8] sm:$0xff]  ;;  %273 = vst [vmem:[%s732_s27 + $0x198] sm:$0xff] %v209_v51 }
  0x55   : > { %274 = vst [vmem:[%s732_s27 + $0x1a0] sm:$0xff] %v210_v52  ;;  %275 = vst [vmem:[%s732_s27 + $0x1a8] sm:$0xff] %v211_v53  ;;  %v212_v54 = vld [vmem:[%s723_s4 + $0x1b0] sm:$0xff]  ;;  %v213_v55 = vld [vmem:[%s723_s4 + $0x1b8] sm:$0xff] }
  0x56   : > { %v214_v56 = vld [vmem:[%s723_s4 + $0x1c0] sm:$0xff]  ;;  %276 = vst [vmem:[%s732_s27 + $0x1b0] sm:$0xff] %v212_v54  ;;  %277 = vst [vmem:[%s732_s27 + $0x1b8] sm:$0xff] %v213_v55  ;;  %v215_v57 = vld [vmem:[%s723_s4 + $0x1c8] sm:$0xff] }
  0x57   : > { %278 = vst [vmem:[%s732_s27 + $0x1c0] sm:$0xff] %v214_v56  ;;  %v216_v58 = vld [vmem:[%s723_s4 + $0x1d0] sm:$0xff]  ;;  %v217_v59 = vld [vmem:[%s723_s4 + $0x1d8] sm:$0xff]  ;;  %279 = vst [vmem:[%s732_s27 + $0x1c8] sm:$0xff] %v215_v57 }
  0x58   : > { %280 = vst [vmem:[%s732_s27 + $0x1d0] sm:$0xff] %v216_v58  ;;  %281 = vst [vmem:[%s732_s27 + $0x1d8] sm:$0xff] %v217_v59  ;;  %v218_v60 = vld [vmem:[%s723_s4 + $0x1e0] sm:$0xff]  ;;  %v219_v61 = vld [vmem:[%s723_s4 + $0x1e8] sm:$0xff] }
  0x59   : > { %v220_v62 = vld [vmem:[%s723_s4 + $0x1f0] sm:$0xff]  ;;  %282 = vst [vmem:[%s732_s27 + $0x1e0] sm:$0xff] %v218_v60  ;;  %283 = vst [vmem:[%s732_s27 + $0x1e8] sm:$0xff] %v219_v61  ;;  %v221_v63 = vld [vmem:[%s723_s4 + $0x1f8] sm:$0xff] }
  0x5a   : > { %284 = vst [vmem:[%s732_s27 + $0x1f0] sm:$0xff] %v220_v62  ;;  %285 = vst [vmem:[%s732_s27 + $0x1f8] sm:$0xff] %v221_v63 }
  0x5b   : > { %520 = shalt.err (!%p517_p5)
}
  0x5c   : > { %s521_s17 = scalar_lea.hbm %s853_s2, 8192  ;;  %s525_s24 = scalar_lea.hbm %s916_s1, 16384 }
  0x5d   : > { %p522_p4 = scmp.ne.s32.totalorder %s853_s2, %s521_s17  ;;  %p526_p12 = scmp.lt.u32.totalorder %s853_s2, %s916_s1 }
  0x5e   : > { %p527_p1 = scmp.lt.u32.totalorder %s525_s24, %s521_s17  ;;  %p529_p8 = scmp.lt.u32.totalorder %s521_s17, %s853_s2 }
  0x5f   : > { %p523_p7 = pnand %p522_p4, %p924_p9 }
  0x60   : > { %p528_p3 = por %p527_p1, %p526_p12 }
  0x61   : > { %p524_p10 = pneg %p523_p7 }
  0x62   : > { %p530_p11 = por %p529_p8, %p528_p3 }
  0x64   : > { %p531_p0 = pnand %p530_p11, %p524_p10 }
  0x66   : > { %534 = shalt.err (!%p531_p0)
}
  0x67   : > { %s595_s3 = smov 512   ;;  %s596_s4 = smov 32  }
  0x68   : > { %413 = dma.vmem_to_hbm [thread:$0]  (%p924_p9), %s855_s29, 8192, %s853_s2, %s287_s5, %s595_s3, %s595_s3, %s596_s4  }
  0x69 PF: > { %s318_s27 = sand.u32 1, %s569_s6   ;;  %p925_p6 = scmp.ne.s32.totalorder %s921_s21, 0 }
  0x6a   : > { %p926_p13 = scmp.ge.s32.totalorder %s589_s11, 2  ;;  %s319_s18 = scalar_lea.sflag [#allocation4], %s318_s27 }
  0x6c   : > { %p420_p2 = pnand %p926_p13, %p925_p6 }
  0x6e   : > { %564 = dma.done.wait (!%p420_p2), %s319_s18, 8192  }
  0x6f   : > { %566 = vsyncadd (!%p420_p2), %s319_s18, 4294959104  ;;  %s17_s11 = sadd.s32 1, %s589_s11   ;;  %s927_s6 = smov %s573_s7 }
  0x70   : > { %p14_p5 = scmp.ge.s32.totalorder %s17_s11, 4   ;;  %s928_s7 = smov %s577_s8 }
  0x71   : > { %s929_s8 = smov %s663_s20  ;;  %s930_s9 = smov %s585_s10 }
  0x72   : > { %s931_s10 = smov %s933_s14  ;;  %16 = sbr.rel (!%p14_p5) target bundleno = 6 (0x6), region = 69 }
  0x79   :  { %324 = vsyncpa [#allocation3], 1 }
  0x7a   :  { %326 = vsyncpa [#allocation3 + $0x1], 1 }
  0x7b   :  { %327 = vsyncpa [#allocation4], 1 }
  0x7c   :  { %329 = vsyncpa [#allocation4 + $0x1], 1 }

</bundles_post_ra>
